<compile_context>
chip_gen: v5e
topology: v5e:2x2
jax: 0.10.0
libtpu: 0.0.40
codegen_flags: <defaults>
</compile_context>

<pallas_src>
import jax
import jax.numpy as jnp
from jax.experimental import pallas as pl
from jax.experimental.pallas import tpu as pltpu


def _metric_calc_kernel(h_ref, w_ref, o_ref):
    # h_ref: (tm, tn) tile of h; w_ref: (1, tn) weight slice.
    # Broadcast multiply over the sublane (row) axis -> VPU elementwise.
    o_ref[...] = h_ref[...] * w_ref[...]


def _round_up(x, m):
    return -(-x // m) * m


def _tpu_defaults():
    """Per-generation (vmem_budget_bytes, vmem_limit_cap_bytes, tensorcores)."""
    try:
        kind = jax.devices()[0].device_kind.lower()
    except Exception:  # CPU interpret / unknown
        kind = ""
    if "v7" in kind:
        # v7x: 64 MiB physical VMEM, 2 TCs, ~3.2 TB/s HBM -> bigger per-step
        # payload, but keep clear headroom under 64 MiB (cap 40 MiB).
        return 24 << 20, 40 << 20, 2
    if "v6" in kind:
        return 16 << 20, 48 << 20, 1
    # v5e / unknown: conservative; explicit vmem_limit still lifts the 16 MiB
    # scoped default when needed.
    return 12 << 20, 48 << 20, 1


def _choose_tiles(n_rows, n_cols, itemsize, vmem_budget_bytes, num_cores):
    """Pick (tm, tn) so the double-buffered tile footprint fits the budget."""
    # Sublane granularity depends on dtype packing (f32: 8, bf16: 16, int8: 32).
    sub = max(8, 32 // max(1, itemsize))

    # Lane tile: keep the full width whenever an 8-row full-width tile fits the
    # budget (contiguous DMAs, 1-D grid).  Only block lanes for very wide cols,
    # in multiples of 128 so stores stay lane-dense.
    if n_cols <= 128 or 4 * sub * n_cols * itemsize <= vmem_budget_bytes:
        tn = n_cols
    else:
        tn = (vmem_budget_bytes // (4 * sub * itemsize)) // 128 * 128
        tn = max(128, min(tn, (n_cols // 128) * 128))

    # Row tile: biggest multiple of `sub` whose double-buffered (h in + out)
    # footprint fits the budget; cap at 1024 rows (roofline plateaus ~85-86%).
    tm = vmem_budget_bytes // (4 * tn * itemsize)
    tm = max(sub, min(tm, 1024))
    if n_rows <= sub:
        tm = n_rows  # full-extent row block (always legal)
    else:
        tm = max(sub, min((tm // sub) * sub, (n_rows // sub) * sub))
        if num_cores > 1:
            # Keep the parallel row axis balanced across TensorCores (v7x).
            blocks = -(-n_rows // tm)
            want = max(_round_up(blocks, num_cores), num_cores)
            if n_rows >= 4 * num_cores * sub:
                want = max(want, 4 * num_cores)
            if blocks < want or blocks % num_cores != 0:
                tm_bal = _round_up(-(-n_rows // want), sub)
                tm = max(sub, min(tm, tm_bal))
    return tm, tn


def metric_calc_layer(
    h: jax.Array,
    weight: jax.Array,
    *,
    block_rows: int | None = None,
    block_cols: int | None = None,
    vmem_budget_bytes: int | None = None,
    min_pallas_bytes: int = 8 << 20,
    force_pallas: bool = False,
) -> jax.Array:
    """out[i, j] = h[i, j] * weight[0, j]  (MetricCalcLayer.forward)."""
    N, nhid = h.shape
    assert weight.shape == (1, nhid)
    itemsize = jnp.dtype(h.dtype).itemsize
    w = weight.astype(h.dtype)

    # Dispatch: a standalone broadcast-multiply kernel can at best match XLA's
    # HBM roofline while blocking fusion with producers/consumers (an entire
    # extra read+write of h).  Keep the Pallas path for isolated, large tensors
    # (or when explicitly forced for testing).
    if not force_pallas and N * nhid * itemsize < min_pallas_bytes:
        return h * w

    budget, limit_cap, num_cores = _tpu_defaults()
    if vmem_budget_bytes is not None:
        budget = vmem_budget_bytes

    # Narrow nhid: fold rows into the lane axis so the output last dim is 128
    # (unmasked, lane-dense stores) -- pure layout plumbing in the wrapper.
    fold = nhid < 128 and 128 % nhid == 0 and (N * nhid) % 128 == 0
    if fold:
        h_run = h.reshape(N * nhid // 128, 128)
        w_run = jnp.tile(w, (1, 128 // nhid))
    else:
        h_run, w_run = h, w

    R, C = h_run.shape
    tm, tn = _choose_tiles(R, C, itemsize, budget, num_cores)
    if block_rows is not None:
        if block_rows != R and block_rows % 8 != 0:
            raise ValueError(
                f"block_rows={block_rows} must be a multiple of 8 or equal {R}")
        tm = block_rows
    if block_cols is not None:
        if block_cols != C and block_cols % 128 != 0:
            raise ValueError(
                f"block_cols={block_cols} must be a multiple of 128 or equal {C}")
        tn = block_cols

    n_row_blocks = pl.cdiv(R, tm)
    n_col_blocks = pl.cdiv(C, tn)

    # Double-buffered (h in + out) tiles plus the double-buffered weight slice,
    # with ~25% headroom; clipped under the per-generation cap.
    tile_bytes = 4 * tm * tn * itemsize + 2 * tn * itemsize
    vmem_limit = int(min(max(tile_bytes + tile_bytes // 4, 16 << 20), limit_cap))

    cost = pl.CostEstimate(
        flops=N * nhid,
        transcendentals=0,
        bytes_accessed=(2 * N * nhid + nhid) * itemsize,
    )

    if n_col_blocks == 1:
        # 1-D row grid: single contiguous DMA per step, weight fetched once.
        grid = (n_row_blocks,)
        in_specs = [
            pl.BlockSpec((tm, tn), lambda i: (i, 0)),   # h tile
            pl.BlockSpec((1, tn), lambda i: (0, 0)),    # full weight row
        ]
        out_specs = pl.BlockSpec((tm, tn), lambda i: (i, 0))
        dims = ("parallel",)
    else:
        # cols outer / rows inner: weight block index is constant across the
        # inner loop so its DMA is not re-issued every step.
        grid = (n_col_blocks, n_row_blocks)
        in_specs = [
            pl.BlockSpec((tm, tn), lambda j, i: (i, j)),  # h tile
            pl.BlockSpec((1, tn), lambda j, i: (0, j)),   # weight slice
        ]
        out_specs = pl.BlockSpec((tm, tn), lambda j, i: (i, j))
        dims = ("parallel", "parallel")

    out = pl.pallas_call(
        _metric_calc_kernel,
        out_shape=jax.ShapeDtypeStruct((R, C), h.dtype),
        grid_spec=pltpu.PrefetchScalarGridSpec(
            num_scalar_prefetch=0,
            grid=grid,
            in_specs=in_specs,
            out_specs=out_specs,
        ),
        compiler_params=pltpu.CompilerParams(
            dimension_semantics=dims,          # shards across TCs on v7x
            vmem_limit_bytes=vmem_limit,
        ),
        cost_estimate=cost,
    )(h_run, w_run)

    if fold:
        out = out.reshape(N, nhid)
    return out


def xavier_uniform(key, shape, dtype=jnp.float32):
    # torch.nn.init.xavier_uniform_ for a 2-D tensor (fan_out, fan_in) = shape
    fan_out, fan_in = shape
    bound = jnp.sqrt(6.0 / (fan_in + fan_out))
    return jax.random.uniform(key, shape, dtype=dtype, minval=-bound, maxval=bound)


if __name__ == "__main__":
    key = jax.random.PRNGKey(0)
    k_h, k_h2, k_h3, k_w, k_w3 = jax.random.split(key, 5)

    # 1) Basic case: nhid maps exactly onto the 128-lane axis.
    N, nhid = 16, 128
    h = jax.random.normal(k_h, (N, nhid), dtype=jnp.float32)
    weight = xavier_uniform(k_w, (1, nhid))  # nn.Parameter(torch.FloatTensor(1, nhid))

    out = jax.block_until_ready(metric_calc_layer(h, weight, force_pallas=True))
    ref = h * weight
    assert out.shape == (N, nhid)
    assert jnp.allclose(out, ref, atol=1e-6, rtol=1e-6), "mismatch vs reference"

    # 2) Row count that does NOT divide the tile (partial edge block).
    N2 = 20
    h2 = jax.random.normal(k_h2, (N2, nhid), dtype=jnp.float32)
    out2 = jax.block_until_ready(metric_calc_layer(h2, weight, force_pallas=True))
    ref2 = h2 * weight
    assert out2.shape == (N2, nhid)
    assert jnp.allclose(out2, ref2, atol=1e-6, rtol=1e-6), "mismatch (ragged rows)"

    # 3) Narrow nhid: exercises the lane-dense folding path (nhid=32 -> slab of 128).
    N3, nhid3 = 16, 32
    h3 = jax.random.normal(k_h3, (N3, nhid3), dtype=jnp.float32)
    weight3 = xavier_uniform(k_w3, (1, nhid3))
    out3 = jax.block_until_ready(metric_calc_layer(h3, weight3, force_pallas=True))
    ref3 = h3 * weight3
    assert out3.shape == (N3, nhid3)
    assert jnp.allclose(out3, ref3, atol=1e-6, rtol=1e-6), "mismatch (narrow nhid fold)"

    print("KERNEL_OK")
</pallas_src>

<mosaic_0001>
module attributes {stable_mosaic.version = 11 : i64} {
  func.func @_metric_calc_kernel(%arg0: i32, %arg1: memref<16x128xf32, #tpu.memory_space<vmem>>, %arg2: memref<1x128xf32, #tpu.memory_space<vmem>>, %arg3: memref<16x128xf32, #tpu.memory_space<vmem>>) attributes {dimension_semantics = [#tpu.dimension_semantics<parallel>], iteration_bounds = array<i64: 1>, scalar_prefetch = 0 : i64, scratch_operands = 0 : i64, tpu.core_type = #tpu.core_type<tc>, window_params = [{transform_indices = @transform_0, window_bounds = array<i64: 16, 128>}, {pipeline_mode = #tpu.pipeline_mode<synchronous>, transform_indices = @transform_1, window_bounds = array<i64: 1, 128>}, {transform_indices = @transform_2, window_bounds = array<i64: 16, 128>}]} {
    %c0 = arith.constant 0 : index
    %c0_0 = arith.constant 0 : index
    %0 = vector.load %arg1[%c0, %c0_0] : memref<16x128xf32, #tpu.memory_space<vmem>>, vector<16x128xf32>
    %c0_1 = arith.constant 0 : index
    %c0_2 = arith.constant 0 : index
    %1 = vector.load %arg2[%c0_1, %c0_2] : memref<1x128xf32, #tpu.memory_space<vmem>>, vector<1x128xf32>
    %2 = vector.broadcast %1 : vector<1x128xf32> to vector<16x128xf32>
    %3 = arith.mulf %0, %2 : vector<16x128xf32>
    %c0_3 = arith.constant 0 : index
    %c0_4 = arith.constant 0 : index
    %4 = vector.load %arg3[%c0_3, %c0_4] : memref<16x128xf32, #tpu.memory_space<vmem>>, vector<16x128xf32>
    tpu.vector_store %arg3[%c0_3, %c0_4], %3 {strides = array<i32>} : memref<16x128xf32, #tpu.memory_space<vmem>>, vector<16x128xf32>,
    return
  }
  func.func @transform_0(%arg0: i32) -> (i32, i32) {
    %c0_i32 = arith.constant 0 : i32
    %c0_i32_0 = arith.constant 0 : i32
    return %arg0, %c0_i32 : i32, i32
  }
  func.func @transform_1(%arg0: i32) -> (i32, i32) {
    %c0_i32 = arith.constant 0 : i32
    %c0_i32_0 = arith.constant 0 : i32
    %c0_i32_1 = arith.constant 0 : i32
    return %c0_i32, %c0_i32_0 : i32, i32
  }
  func.func @transform_2(%arg0: i32) -> (i32, i32) {
    %c0_i32 = arith.constant 0 : i32
    %c0_i32_0 = arith.constant 0 : i32
    return %arg0, %c0_i32 : i32, i32
  }
}

</mosaic_0001>

<bundles_post_ra>
// kernel: tpu_custom_call.1
= control target key start
LH: loop header
LB: loop body
LE: loop exit
PB: predicated region body
PF: predicated region fallthrough
CT: control target
= control target key end

     0   :  { %7 = vsyncpa [#allocation3], 0  ;;  %s185_s0 = inlined_call_operand.hbm [shape: f32[16,128], index: 0, kind: input, shape index: {}]   ;;  %s186_s1 = inlined_call_operand.hbm [shape: f32[1,128], index: 1, kind: input, shape index: {}]   ;;  %s187_s2 = inlined_call_operand.hbm [shape: f32[16,128], index: 2, kind: output, shape index: {}]  }
   0x1   :  { %8 = vsyncpa [#allocation6], 0 }
   0x2   :  { %9 = vsyncpa [#allocation4], 0  ;;  %s14_s11 = sshll.u32 %s185_s0, 4  ;;  %s156_s12 = smov [#allocation2]   ;;  %s15_s11 = int_to_ptr.hbm [resolvable:$true] %s14_s11 }
   0x3   :  { %s16_s13 = sshll.u32 %s156_s12, 4  ;;  %s28_s16 = sshll.u32 %s186_s1, 4  ;;  %s17_s13 = int_to_ptr.vmem [resolvable:$true] %s16_s13  ;;  %s29_s16 = int_to_ptr.hbm [resolvable:$true] %s28_s16 }
   0x4   :  { %s157_s17 = smov 128   ;;  %s158_s18 = smov 8  }
   0x5   :  { %22 = dma.hbm_to_vmem [thread:$0]  %s15_s11, 256, %s17_s13, [#allocation3], %s157_s17, %s157_s17, %s158_s18  }
   0x6   :  { %s159_s19 = smov [#allocation5]  }
   0x7   :  { %s30_s20 = sshll.u32 %s159_s19, 4  ;;  %s31_s20 = int_to_ptr.vmem [resolvable:$true] %s30_s20 }
   0x8   :  { %33 = dma.hbm_to_vmem [thread:$0]  %s29_s16, 16, %s31_s20, [#allocation6]  }
   0x9   :  { %150 = dma.done.wait [#allocation3], 256  }
   0xa   :  { %151 = vsyncadd [#allocation3], 4294967040 }
   0xb   :  { %152 = dma.done.wait [#allocation6], 16  }
   0xc   :  { %153 = vsyncadd [#allocation6], 4294967280  ;;  %s58_s22 = sshll.u32 %s187_s2, 4  ;;  %v42_v0 = vld [vmem:[#allocation2] sm:$0xff]  ;;  %v77_v1 = vld [vmem:[#allocation5] ss:$0 sm:$0xff]  ;;  %s59_s22 = int_to_ptr.hbm [resolvable:$true] %s58_s22 }
   0xd   :  { %s160_s23 = smov [#allocation7]   ;;  %v43_v2 = vld [vmem:[#allocation2 + $0x8] sm:$0xff]  ;;  %v48_v3 = vmul.f32 %v77_v1, %v42_v0 }
   0xe   :  { %s56_s1 = sshll.u32 %s160_s23, 4  ;;  %v49_v4 = vmul.f32 %v77_v1, %v43_v2  ;;  %s57_s1 = int_to_ptr.vmem [resolvable:$true] %s56_s1 }
   0xf   :  { %50 = vst [vmem:[#allocation7] sm:$0xff] %v48_v3 }
  0x10   :  { %51 = vst [vmem:[#allocation7 + $0x8] sm:$0xff] %v49_v4 }
  0x11   :  { %64 = dma.vmem_to_hbm [thread:$0]  %s57_s1, 256, %s59_s22, [#allocation4], %s157_s17, %s157_s17, %s158_s18  }
  0x12   :  { %154 = dma.done.wait [#allocation4], 256  }
  0x13   :  { %155 = vsyncadd [#allocation4], 4294967040 }
  0x14   :  { %69 = vsyncpa [#allocation3], 1 }
  0x15   :  { %70 = vsyncpa [#allocation6], 1 }
  0x16   :  { %71 = vsyncpa [#allocation4], 1 }

</bundles_post_ra>
